<compile_context>
chip_gen: v7x
topology: tpu7x:2x2x1
jax: 0.10.0
libtpu: 0.0.40
codegen_flags: <defaults>
</compile_context>

<pallas_src>
import functools
import math

import jax
import jax.numpy as jnp
from jax import lax
from jax.experimental import pallas as pl
from jax.experimental.pallas import tpu as pltpu

LANE = 128


def _round_up(x, m):
    return (x + m - 1) // m * m


def _sublane(dtype):
    # dtype-aware minimum sublane multiple: fp32 -> 8, bf16/f16 -> 16, int8/fp8 -> 32
    return {4: 8, 2: 16, 1: 32}[jnp.dtype(dtype).itemsize]


def _pad_cols(a, n):
    pad = n - a.shape[-1]
    return jnp.pad(a, ((0, 0), (0, pad))) if pad else a


def _choose_tile(dim, cap, mult):
    """Largest tile <= cap that divides `dim` and is a multiple of `mult`.

    Falls back to the full dim (always a legal block shape) if no such divisor exists.
    """
    if dim <= cap:
        return dim
    for t in range(min(cap, dim), 0, -1):
        if dim % t == 0 and t % mult == 0:
            return t
    return dim


# ---------------------------------------------------------------------------
# Fused kernel: Q/K/V projections + flash attention (online softmax).
# ---------------------------------------------------------------------------
def _fused_attn_kernel(q_ref, k_ref, v_ref,
                       wq_ref, bq_ref, wk_ref, bk_ref, wv_ref, bv_ref,
                       o_ref, qp, m, acc, *, scale, v_dim):
    ki = pl.program_id(2)

    @pl.when(ki == 0)
    def _():
        # Q projection once per (b, q-tile); fold the 1/sqrt(k_dim) scale into Q.
        qblk = q_ref[0]                                               # (tq, D)
        qp[...] = ((jnp.dot(qblk, wq_ref[...],
                            preferred_element_type=jnp.float32)
                    + bq_ref[...]) * scale).astype(qp.dtype)
        m[...] = jnp.full_like(m, -jnp.inf)
        acc[...] = jnp.zeros_like(acc)

    # Project this K/V tile in VMEM (fused; cheap recompute on the MXU).
    kp = (jnp.dot(k_ref[0], wk_ref[...], preferred_element_type=jnp.float32)
          + bk_ref[...]).astype(qp.dtype)                             # (tk, Dqp)
    vp = (jnp.dot(v_ref[0], wv_ref[...], preferred_element_type=jnp.float32)
          + bv_ref[...]).astype(qp.dtype)                             # (tk, Dvp); col v_dim == 1.0

    # Scores: contract on the last dim of both operands (no materialized transpose).
    s = lax.dot_general(qp[...], kp, (((1,), (1,)), ((), ())),
                        preferred_element_type=jnp.float32)           # (tq, tk)

    # Online softmax update; the row-sum is folded into P@V via vp's all-ones column.
    m_new = jnp.maximum(m[...], jnp.max(s, axis=-1, keepdims=True))
    alpha = jnp.exp(m[...] - m_new)
    p = jnp.exp(s - m_new)
    acc[...] = alpha * acc[...] + jnp.dot(p.astype(vp.dtype), vp,
                                          preferred_element_type=jnp.float32)
    m[...] = m_new

    @pl.when(ki == pl.num_programs(2) - 1)
    def _():
        a = acc[...]
        l = a[:, v_dim:v_dim + 1]          # running denominator (ones-column of vp)
        o_ref[0] = (a / l).astype(o_ref.dtype)   # exact divide: once per q-tile


# ---------------------------------------------------------------------------
# Public wrapper matching the PyTorch module's forward.
# ---------------------------------------------------------------------------
def attention(q, k, v, wq, bq, wk, bk, wv, bv, *, tq_cap=512, tk_cap=1024):
    """q: (B, Sq, D); k, v: (B, Sk, D); w*: (D, out); b*: (1, out)."""
    B, Sq, D = q.shape
    _, Sk, _ = k.shape
    Dq, Dk, Dv = wq.shape[1], wk.shape[1], wv.shape[1]
    assert Dq == Dk, "q_dim must equal k_dim for Q @ K^T"

    sub = _sublane(q.dtype)

    # Lane-dense padding of the projection output dims (in-VMEM only — no padded HBM
    # intermediates). Padded Q/K columns are zero so Q@K^T is exact; V gets one extra
    # all-ones column at index Dv (bias = 1, weight col = 0) carrying the softmax row-sum.
    Dqp = _round_up(Dq, LANE)
    Dvp = _round_up(Dv + 1, LANE)
    wq_p, bq_p = _pad_cols(wq, Dqp), _pad_cols(bq, Dqp)
    wk_p, bk_p = _pad_cols(wk, Dqp), _pad_cols(bk, Dqp)
    wv_p = _pad_cols(wv, Dvp)
    bv_p = _pad_cols(bv, Dvp).at[0, Dv].set(1.0)

    tq = _choose_tile(Sq, tq_cap, sub)
    tk = _choose_tile(Sk, tk_cap, sub)
    nq, nk = Sq // tq, Sk // tk

    scale = 1.0 / math.sqrt(float(Dk))   # scale uses the original (unpadded) k_dim

    # VMEM budget from the actual buffer math (double-buffered streams + resident weights
    # + scratch); request it with 2x headroom, capped at 64 MiB so it is valid on v7x too.
    itemsize = jnp.dtype(q.dtype).itemsize
    budget = (2 * (tq * D + 2 * tk * D) * itemsize            # q/k/v tiles (double-buffered)
              + (D * (2 * Dqp + Dvp) + 2 * Dqp + Dvp) * itemsize  # resident weights + biases
              + 2 * tq * Dvp * itemsize                       # output tile (double-buffered)
              + tq * Dqp * itemsize                           # qp scratch
              + tq * (Dvp + 1) * 4)                           # acc + m (fp32)
    vmem_limit = int(min(max(2 * budget, 32 * 1024 * 1024), 64 * 1024 * 1024))

    kernel = functools.partial(_fused_attn_kernel, scale=scale, v_dim=Dv)
    out = pl.pallas_call(
        kernel,
        out_shape=jax.ShapeDtypeStruct((B, Sq, Dvp), q.dtype),
        grid_spec=pltpu.PrefetchScalarGridSpec(
            num_scalar_prefetch=0,
            # B and nq lead as "parallel" axes (megacore / v7x 2-TC sharding);
            # the Sk reduction axis is last and "arbitrary".
            grid=(B, nq, nk),
            in_specs=[
                pl.BlockSpec((1, tq, D), lambda b, qi, ki: (b, qi, 0)),   # q (raw)
                pl.BlockSpec((1, tk, D), lambda b, qi, ki: (b, ki, 0)),   # k (raw)
                pl.BlockSpec((1, tk, D), lambda b, qi, ki: (b, ki, 0)),   # v (raw)
                pl.BlockSpec((D, Dqp), lambda b, qi, ki: (0, 0)),         # Wq (resident)
                pl.BlockSpec((1, Dqp), lambda b, qi, ki: (0, 0)),         # bq
                pl.BlockSpec((D, Dqp), lambda b, qi, ki: (0, 0)),         # Wk (resident)
                pl.BlockSpec((1, Dqp), lambda b, qi, ki: (0, 0)),         # bk
                pl.BlockSpec((D, Dvp), lambda b, qi, ki: (0, 0)),         # Wv (resident)
                pl.BlockSpec((1, Dvp), lambda b, qi, ki: (0, 0)),         # bv (+ ones col)
            ],
            out_specs=pl.BlockSpec((1, tq, Dvp), lambda b, qi, ki: (b, qi, 0)),
            scratch_shapes=[
                pltpu.VMEM((tq, Dqp), q.dtype),       # scaled Q tile
                pltpu.VMEM((tq, 1), jnp.float32),     # running max m
                pltpu.VMEM((tq, Dvp), jnp.float32),   # output accumulator (col Dv == l)
            ],
        ),
        compiler_params=pltpu.CompilerParams(
            dimension_semantics=("parallel", "parallel", "arbitrary"),
            vmem_limit_bytes=vmem_limit),
    )(q, k, v, wq_p, bq_p, wk_p, bk_p, wv_p, bv_p)
    return out[..., :Dv]


# ---------------------------------------------------------------------------
# Test harness.
# ---------------------------------------------------------------------------
def _linear_init(key, in_dim, out_dim):
    """Deterministic init matching nn.Linear's U(-1/sqrt(in), 1/sqrt(in))."""
    kw, kb = jax.random.split(key)
    bound = 1.0 / (in_dim ** 0.5)
    w = jax.random.uniform(kw, (in_dim, out_dim), jnp.float32, -bound, bound)
    b = jax.random.uniform(kb, (1, out_dim), jnp.float32, -bound, bound)
    return w, b


def _reference(q, k, v, wq, bq, wk, bk, wv, bv):
    Q = q @ wq + bq
    K = k @ wk + bk
    V = v @ wv + bv
    s = jnp.einsum("bqd,bkd->bqk", Q, K) / (wk.shape[1] ** 0.5)
    p = jax.nn.softmax(s, axis=-1)
    return jnp.einsum("bqk,bkd->bqd", p, V)


if __name__ == "__main__":
    # Small shapes consistent with the module's forward.
    B, Sq, Sk = 2, 8, 8
    attention_dim, q_dim, k_dim, v_dim = 32, 16, 16, 24

    key = jax.random.PRNGKey(0)
    kq, kk, kv, kwq, kwk, kwv = jax.random.split(key, 6)

    q = jax.random.normal(kq, (B, Sq, attention_dim), jnp.float32)
    k = jax.random.normal(kk, (B, Sk, attention_dim), jnp.float32)
    v = jax.random.normal(kv, (B, Sk, attention_dim), jnp.float32)

    # nn.Linear is instantiated with its default bias=True in the module.
    wq, bq = _linear_init(kwq, attention_dim, q_dim)
    wk, bk = _linear_init(kwk, attention_dim, k_dim)
    wv, bv = _linear_init(kwv, attention_dim, v_dim)

    out = attention(q, k, v, wq, bq, wk, bk, wv, bv)
    out = jax.block_until_ready(out)

    ref = _reference(q, k, v, wq, bq, wk, bk, wv, bv)
    assert out.shape == (B, Sq, v_dim)
    # Exact divide in the finalize branch -> tight tolerance (fp32 matmuls, fp32 acc).
    assert jnp.allclose(out, ref, atol=1e-4, rtol=1e-4), float(jnp.max(jnp.abs(out - ref)))

    print("KERNEL_OK")
</pallas_src>

<mosaic_0001>
module attributes {stable_mosaic.version = 11 : i64} {
  func.func @_fused_attn_kernel(%arg0: i32, %arg1: i32, %arg2: i32, %arg3: memref<1x8x32xf32, #tpu.memory_space<vmem>>, %arg4: memref<1x8x32xf32, #tpu.memory_space<vmem>>, %arg5: memref<1x8x32xf32, #tpu.memory_space<vmem>>, %arg6: memref<32x128xf32, #tpu.memory_space<vmem>>, %arg7: memref<1x128xf32, #tpu.memory_space<vmem>>, %arg8: memref<32x128xf32, #tpu.memory_space<vmem>>, %arg9: memref<1x128xf32, #tpu.memory_space<vmem>>, %arg10: memref<32x128xf32, #tpu.memory_space<vmem>>, %arg11: memref<1x128xf32, #tpu.memory_space<vmem>>, %arg12: memref<1x8x128xf32, #tpu.memory_space<vmem>>, %arg13: memref<8x128xf32, #tpu.memory_space<vmem>>, %arg14: memref<8x1xf32, #tpu.memory_space<vmem>>, %arg15: memref<8x128xf32, #tpu.memory_space<vmem>>) attributes {dimension_semantics = [#tpu.dimension_semantics<parallel>, #tpu.dimension_semantics<parallel>, #tpu.dimension_semantics<arbitrary>], iteration_bounds = array<i64: 2, 1, 1>, scalar_prefetch = 0 : i64, scratch_operands = 3 : i64, tpu.core_type = #tpu.core_type<tc>, window_params = [{transform_indices = @transform_0, window_bounds = array<i64: 1, 8, 32>}, {transform_indices = @transform_1, window_bounds = array<i64: 1, 8, 32>}, {transform_indices = @transform_2, window_bounds = array<i64: 1, 8, 32>}, {pipeline_mode = #tpu.pipeline_mode<synchronous>, transform_indices = @transform_3, window_bounds = array<i64: 32, 128>}, {pipeline_mode = #tpu.pipeline_mode<synchronous>, transform_indices = @transform_4, window_bounds = array<i64: 1, 128>}, {pipeline_mode = #tpu.pipeline_mode<synchronous>, transform_indices = @transform_5, window_bounds = array<i64: 32, 128>}, {pipeline_mode = #tpu.pipeline_mode<synchronous>, transform_indices = @transform_6, window_bounds = array<i64: 1, 128>}, {pipeline_mode = #tpu.pipeline_mode<synchronous>, transform_indices = @transform_7, window_bounds = array<i64: 32, 128>}, {pipeline_mode = #tpu.pipeline_mode<synchronous>, transform_indices = @transform_8, window_bounds = array<i64: 1, 128>}, {transform_indices = @transform_9, window_bounds = array<i64: 1, 8, 128>}]} {
    %c0_i32 = arith.constant 0 : i32
    %0 = arith.cmpi eq, %arg2, %c0_i32 : i32
    %1 = arith.extui %0 : i1 to i32
    %c0_i32_0 = arith.constant 0 : i32
    %2 = arith.cmpi ne, %1, %c0_i32_0 : i32
    scf.if %2 {
      %c0_32 = arith.constant 0 : index
      %c0_33 = arith.constant 0 : index
      %c0_34 = arith.constant 0 : index
      %39 = vector.load %arg3[%c0_32, %c0_33, %c0_34] : memref<1x8x32xf32, #tpu.memory_space<vmem>>, vector<1x8x32xf32>
      %40 = vector.shape_cast %39 : vector<1x8x32xf32> to vector<8x32xf32>
      %c0_35 = arith.constant 0 : index
      %c0_36 = arith.constant 0 : index
      %41 = vector.load %arg6[%c0_35, %c0_36] : memref<32x128xf32, #tpu.memory_space<vmem>>, vector<32x128xf32>
      %cst_37 = arith.constant dense<0.000000e+00> : vector<8x128xf32>
      %42 = tpu.matmul %40, %41, %cst_37 {dimension_numbers = #tpu.dot_dimension_numbers<[1], [0], [0], [1], [0, 0, 1, 1], [], []>} : vector<8x32xf32>, vector<32x128xf32>, vector<8x128xf32> -> vector<8x128xf32>
      %c0_38 = arith.constant 0 : index
      %c0_39 = arith.constant 0 : index
      %43 = vector.load %arg7[%c0_38, %c0_39] : memref<1x128xf32, #tpu.memory_space<vmem>>, vector<1x128xf32>
      %44 = vector.broadcast %43 : vector<1x128xf32> to vector<8x128xf32>
      %45 = arith.addf %42, %44 : vector<8x128xf32>
      %cst_40 = arith.constant 2.500000e-01 : f32
      %46 = vector.broadcast %cst_40 : f32 to vector<8x128xf32>
      %47 = arith.mulf %45, %46 : vector<8x128xf32>
      %c0_41 = arith.constant 0 : index
      %c0_42 = arith.constant 0 : index
      %48 = vector.load %arg13[%c0_41, %c0_42] : memref<8x128xf32, #tpu.memory_space<vmem>>, vector<8x128xf32>
      tpu.vector_store %arg13[%c0_41, %c0_42], %47 {strides = array<i32>} : memref<8x128xf32, #tpu.memory_space<vmem>>, vector<8x128xf32>,
      %cst_43 = arith.constant 0xFF800000 : f32
      %49 = vector.broadcast %cst_43 : f32 to vector<8x1xf32>
      %c0_44 = arith.constant 0 : index
      %c0_45 = arith.constant 0 : index
      %50 = vector.load %arg14[%c0_44, %c0_45] : memref<8x1xf32, #tpu.memory_space<vmem>>, vector<8x1xf32>
      tpu.vector_store %arg14[%c0_44, %c0_45], %49 {strides = array<i32>} : memref<8x1xf32, #tpu.memory_space<vmem>>, vector<8x1xf32>,
      %cst_46 = arith.constant 0.000000e+00 : f32
      %51 = vector.broadcast %cst_46 : f32 to vector<8x128xf32>
      %c0_47 = arith.constant 0 : index
      %c0_48 = arith.constant 0 : index
      %52 = vector.load %arg15[%c0_47, %c0_48] : memref<8x128xf32, #tpu.memory_space<vmem>>, vector<8x128xf32>
      tpu.vector_store %arg15[%c0_47, %c0_48], %51 {strides = array<i32>} : memref<8x128xf32, #tpu.memory_space<vmem>>, vector<8x128xf32>,
    } else {
    }
    %c0 = arith.constant 0 : index
    %c0_1 = arith.constant 0 : index
    %c0_2 = arith.constant 0 : index
    %3 = vector.load %arg4[%c0, %c0_1, %c0_2] : memref<1x8x32xf32, #tpu.memory_space<vmem>>, vector<1x8x32xf32>
    %4 = vector.shape_cast %3 : vector<1x8x32xf32> to vector<8x32xf32>
    %c0_3 = arith.constant 0 : index
    %c0_4 = arith.constant 0 : index
    %5 = vector.load %arg8[%c0_3, %c0_4] : memref<32x128xf32, #tpu.memory_space<vmem>>, vector<32x128xf32>
    %cst = arith.constant dense<0.000000e+00> : vector<8x128xf32>
    %6 = tpu.matmul %4, %5, %cst {dimension_numbers = #tpu.dot_dimension_numbers<[1], [0], [0], [1], [0, 0, 1, 1], [], []>} : vector<8x32xf32>, vector<32x128xf32>, vector<8x128xf32> -> vector<8x128xf32>
    %c0_5 = arith.constant 0 : index
    %c0_6 = arith.constant 0 : index
    %7 = vector.load %arg9[%c0_5, %c0_6] : memref<1x128xf32, #tpu.memory_space<vmem>>, vector<1x128xf32>
    %8 = vector.broadcast %7 : vector<1x128xf32> to vector<8x128xf32>
    %9 = arith.addf %6, %8 : vector<8x128xf32>
    %c0_7 = arith.constant 0 : index
    %c0_8 = arith.constant 0 : index
    %c0_9 = arith.constant 0 : index
    %10 = vector.load %arg5[%c0_7, %c0_8, %c0_9] : memref<1x8x32xf32, #tpu.memory_space<vmem>>, vector<1x8x32xf32>
    %11 = vector.shape_cast %10 : vector<1x8x32xf32> to vector<8x32xf32>
    %c0_10 = arith.constant 0 : index
    %c0_11 = arith.constant 0 : index
    %12 = vector.load %arg10[%c0_10, %c0_11] : memref<32x128xf32, #tpu.memory_space<vmem>>, vector<32x128xf32>
    %cst_12 = arith.constant dense<0.000000e+00> : vector<8x128xf32>
    %13 = tpu.matmul %11, %12, %cst_12 {dimension_numbers = #tpu.dot_dimension_numbers<[1], [0], [0], [1], [0, 0, 1, 1], [], []>} : vector<8x32xf32>, vector<32x128xf32>, vector<8x128xf32> -> vector<8x128xf32>
    %c0_13 = arith.constant 0 : index
    %c0_14 = arith.constant 0 : index
    %14 = vector.load %arg11[%c0_13, %c0_14] : memref<1x128xf32, #tpu.memory_space<vmem>>, vector<1x128xf32>
    %15 = vector.broadcast %14 : vector<1x128xf32> to vector<8x128xf32>
    %16 = arith.addf %13, %15 : vector<8x128xf32>
    %c0_15 = arith.constant 0 : index
    %c0_16 = arith.constant 0 : index
    %17 = vector.load %arg13[%c0_15, %c0_16] : memref<8x128xf32, #tpu.memory_space<vmem>>, vector<8x128xf32>
    %cst_17 = arith.constant dense<0.000000e+00> : vector<8x8xf32>
    %18 = tpu.matmul %17, %9, %cst_17 {dimension_numbers = #tpu.dot_dimension_numbers<[1], [1], [0], [0], [0, 0, 1, 0], [], []>} : vector<8x128xf32>, vector<8x128xf32>, vector<8x8xf32> -> vector<8x8xf32>
    %c0_18 = arith.constant 0 : index
    %c0_19 = arith.constant 0 : index
    %19 = vector.load %arg14[%c0_18, %c0_19] : memref<8x1xf32, #tpu.memory_space<vmem>>, vector<8x1xf32>
    %cst_20 = arith.constant dense<0xFF800000> : vector<8xf32>
    %20 = vector.multi_reduction <maximumf>, %18, %cst_20 [1] : vector<8x8xf32> to vector<8xf32>
    %21 = vector.shape_cast %20 : vector<8xf32> to vector<8x1xf32>
    %22 = arith.maximumf %19, %21 : vector<8x1xf32>
    %c0_21 = arith.constant 0 : index
    %c0_22 = arith.constant 0 : index
    %23 = vector.load %arg14[%c0_21, %c0_22] : memref<8x1xf32, #tpu.memory_space<vmem>>, vector<8x1xf32>
    %24 = arith.subf %23, %22 : vector<8x1xf32>
    %25 = math.exp %24 : vector<8x1xf32>
    %26 = vector.broadcast %22 : vector<8x1xf32> to vector<8x8xf32>
    %27 = arith.subf %18, %26 : vector<8x8xf32>
    %28 = math.exp %27 : vector<8x8xf32>
    %c0_23 = arith.constant 0 : index
    %c0_24 = arith.constant 0 : index
    %29 = vector.load %arg15[%c0_23, %c0_24] : memref<8x128xf32, #tpu.memory_space<vmem>>, vector<8x128xf32>
    %30 = vector.broadcast %25 : vector<8x1xf32> to vector<8x128xf32>
    %31 = arith.mulf %30, %29 : vector<8x128xf32>
    %cst_25 = arith.constant dense<0.000000e+00> : vector<8x128xf32>
    %32 = tpu.matmul %28, %16, %cst_25 {dimension_numbers = #tpu.dot_dimension_numbers<[1], [0], [0], [1], [0, 0, 1, 1], [], []>} : vector<8x8xf32>, vector<8x128xf32>, vector<8x128xf32> -> vector<8x128xf32>
    %33 = arith.addf %31, %32 : vector<8x128xf32>
    %c0_26 = arith.constant 0 : index
    %c0_27 = arith.constant 0 : index
    %34 = vector.load %arg15[%c0_26, %c0_27] : memref<8x128xf32, #tpu.memory_space<vmem>>, vector<8x128xf32>
    tpu.vector_store %arg15[%c0_26, %c0_27], %33 {strides = array<i32>} : memref<8x128xf32, #tpu.memory_space<vmem>>, vector<8x128xf32>,
    %c0_28 = arith.constant 0 : index
    %c0_29 = arith.constant 0 : index
    %35 = vector.load %arg14[%c0_28, %c0_29] : memref<8x1xf32, #tpu.memory_space<vmem>>, vector<8x1xf32>
    tpu.vector_store %arg14[%c0_28, %c0_29], %22 {strides = array<i32>} : memref<8x1xf32, #tpu.memory_space<vmem>>, vector<8x1xf32>,
    %c0_i32_30 = arith.constant 0 : i32
    %36 = arith.cmpi eq, %arg2, %c0_i32_30 : i32
    %37 = arith.extui %36 : i1 to i32
    %c0_i32_31 = arith.constant 0 : i32
    %38 = arith.cmpi ne, %37, %c0_i32_31 : i32
    scf.if %38 {
      %c0_32 = arith.constant 0 : index
      %c0_33 = arith.constant 0 : index
      %39 = vector.load %arg15[%c0_32, %c0_33] : memref<8x128xf32, #tpu.memory_space<vmem>>, vector<8x128xf32>
      %40 = vector.extract_strided_slice %39 {offsets = [0, 24], sizes = [8, 1], strides = [1, 1]} : vector<8x128xf32> to vector<8x1xf32>
      %41 = vector.broadcast %40 : vector<8x1xf32> to vector<8x128xf32>
      %42 = arith.divf %39, %41 : vector<8x128xf32>
      %c0_34 = arith.constant 0 : index
      %c0_35 = arith.constant 0 : index
      %c0_36 = arith.constant 0 : index
      %43 = vector.load %arg12[%c0_34, %c0_35, %c0_36] : memref<1x8x128xf32, #tpu.memory_space<vmem>>, vector<1x8x128xf32>
      %44 = vector.shape_cast %43 : vector<1x8x128xf32> to vector<8x128xf32>
      %45 = vector.shape_cast %42 : vector<8x128xf32> to vector<1x8x128xf32>
      tpu.vector_store %arg12[%c0_34, %c0_35, %c0_36], %45 {strides = array<i32>} : memref<1x8x128xf32, #tpu.memory_space<vmem>>, vector<1x8x128xf32>,
    } else {
    }
    return
  }
  func.func @transform_0(%arg0: i32, %arg1: i32, %arg2: i32) -> (i32, i32, i32) {
    %c0_i32 = arith.constant 0 : i32
    %c0_i32_0 = arith.constant 0 : i32
    return %arg0, %arg1, %c0_i32 : i32, i32, i32
  }
  func.func @transform_1(%arg0: i32, %arg1: i32, %arg2: i32) -> (i32, i32, i32) {
    %c0_i32 = arith.constant 0 : i32
    %c0_i32_0 = arith.constant 0 : i32
    return %arg0, %arg2, %c0_i32 : i32, i32, i32
  }
  func.func @transform_2(%arg0: i32, %arg1: i32, %arg2: i32) -> (i32, i32, i32) {
    %c0_i32 = arith.constant 0 : i32
    %c0_i32_0 = arith.constant 0 : i32
    return %arg0, %arg2, %c0_i32 : i32, i32, i32
  }
  func.func @transform_3(%arg0: i32, %arg1: i32, %arg2: i32) -> (i32, i32) {
    %c0_i32 = arith.constant 0 : i32
    %c0_i32_0 = arith.constant 0 : i32
    %c0_i32_1 = arith.constant 0 : i32
    return %c0_i32, %c0_i32_0 : i32, i32
  }
  func.func @transform_4(%arg0: i32, %arg1: i32, %arg2: i32) -> (i32, i32) {
    %c0_i32 = arith.constant 0 : i32
    %c0_i32_0 = arith.constant 0 : i32
    %c0_i32_1 = arith.constant 0 : i32
    return %c0_i32, %c0_i32_0 : i32, i32
  }
  func.func @transform_5(%arg0: i32, %arg1: i32, %arg2: i32) -> (i32, i32) {
    %c0_i32 = arith.constant 0 : i32
    %c0_i32_0 = arith.constant 0 : i32
    %c0_i32_1 = arith.constant 0 : i32
    return %c0_i32, %c0_i32_0 : i32, i32
  }
  func.func @transform_6(%arg0: i32, %arg1: i32, %arg2: i32) -> (i32, i32) {
    %c0_i32 = arith.constant 0 : i32
    %c0_i32_0 = arith.constant 0 : i32
    %c0_i32_1 = arith.constant 0 : i32
    return %c0_i32, %c0_i32_0 : i32, i32
  }
  func.func @transform_7(%arg0: i32, %arg1: i32, %arg2: i32) -> (i32, i32) {
    %c0_i32 = arith.constant 0 : i32
    %c0_i32_0 = arith.constant 0 : i32
    %c0_i32_1 = arith.constant 0 : i32
    return %c0_i32, %c0_i32_0 : i32, i32
  }
  func.func @transform_8(%arg0: i32, %arg1: i32, %arg2: i32) -> (i32, i32) {
    %c0_i32 = arith.constant 0 : i32
    %c0_i32_0 = arith.constant 0 : i32
    %c0_i32_1 = arith.constant 0 : i32
    return %c0_i32, %c0_i32_0 : i32, i32
  }
  func.func @transform_9(%arg0: i32, %arg1: i32, %arg2: i32) -> (i32, i32, i32) {
    %c0_i32 = arith.constant 0 : i32
    %c0_i32_0 = arith.constant 0 : i32
    return %arg0, %arg1, %c0_i32 : i32, i32, i32
  }
}

</mosaic_0001>

<bundles_post_ra>
// kernel: tpu_custom_call.1
= control target key start
LH: loop header
LB: loop body
LE: loop exit
PB: predicated region body
PF: predicated region fallthrough
CT: control target
= control target key end

     0   :  { %s2050_s0 = inlined_call_operand.hbm [shape: f32[2,8,32], index: 0, kind: input, shape index: {}]   ;;  %s2051_s1 = inlined_call_operand.hbm [shape: f32[2,8,32], index: 1, kind: input, shape index: {}]   ;;  %s2052_s2 = inlined_call_operand.hbm [shape: f32[2,8,32], index: 2, kind: input, shape index: {}]   ;;  %s2053_s3 = inlined_call_operand.hbm [shape: f32[32,128], index: 3, kind: input, shape index: {}]   ;;  %s2054_s4 = inlined_call_operand.vmem [shape: f32[1,128], index: 4, kind: input, shape index: {}]   ;;  %s2055_s5 = inlined_call_operand.hbm [shape: f32[32,128], index: 5, kind: input, shape index: {}]   ;;  %s2056_s6 = inlined_call_operand.vmem [shape: f32[1,128], index: 6, kind: input, shape index: {}]   ;;  %s2057_s7 = inlined_call_operand.hbm [shape: f32[32,128], index: 7, kind: input, shape index: {}]   ;;  %s2058_s8 = inlined_call_operand.vmem [shape: f32[1,128], index: 8, kind: input, shape index: {}]   ;;  %s2059_s9 = inlined_call_operand.hbm [shape: f32[2,8,128], index: 9, kind: output, shape index: {}]  }
   0x1   :  { %2086 = sst [smem:[#allocation30_spill]] %s2051_s1 }
   0x2   :  { %2087 = sst [smem:[#allocation31_spill]] %s2053_s3 }
   0x3   :  { %2088 = sst [smem:[#allocation32_spill]] %s2054_s4 }
   0x4   :  { %2089 = sst [smem:[#allocation33_spill]] %s2058_s8 }
   0x5   :  { %2090 = sst [smem:[#allocation34_spill]] %s2059_s9 }
   0x6   :  { %14 = vsyncpa [#allocation6], 0 }
   0x7   :  { %16 = vsyncpa [#allocation6 + $0x1], 0 }
   0x8   :  { %17 = vsyncpa [#allocation9], 0 }
   0x9   :  { %19 = vsyncpa [#allocation9 + $0x1], 0 }
   0xa   :  { %20 = vsyncpa [#allocation12], 0 }
   0xb   :  { %21 = vsyncpa [#allocation15], 0 }
   0xc   :  { %22 = vsyncpa [#allocation7], 0 }
   0xd   :  { %24 = vsyncpa [#allocation7 + $0x1], 0  ;;  %s1683_s30 = smov 0   ;;  %s1685_s10 = smov 0  }
   0xe   :  { %s1687_s11 = smov 0   ;;  %s1689_s12 = smov 0  }
   0xf   :  { %s1691_s13 = smov 0   ;;  %s1693_s14 = smov 0  }
  0x10 LB: > { %2091 = sst [smem:[#allocation22_spill]] %s1596_s30  ;;  %s1714_s15 = sadd.s32 4294967295, %s1616_s14   ;;  %s1616_s14 = sphi %s1693_s14, %s30_s14   ;;  %s1612_s13 = sphi %s1691_s13, %s2137_s13   ;;  %s1608_s12 = sphi %s1689_s12, %s2136_s12   ;;  %s1604_s11 = sphi %s1687_s11, %s2140_s11   ;;  %s1600_s10 = sphi %s1685_s10, %s2139_s10   ;;  %s1596_s30 = sphi %s1683_s30, %s2138_s30  }
  0x11   : > { %2092 = sst [smem:[#allocation23_spill]] %s1608_s12  ;;  %s1116_s16 = sadd.s32 4294967294, %s1616_s14  }
  0x12   : > { %2093 = sst [smem:[#allocation24_spill]] %s1612_s13  ;;  %p71_p0 = scmp.ne.s32.totalorder %s1600_s10, %s1596_s30 }
  0x13   : > { %2094 = sst [smem:[#allocation25_spill]] %s1616_s14  ;;  %p2060_p1 = scmp.eq.s32.totalorder %s1714_s15, 0 }
  0x14   : > { %p285_p3 = scmp.eq.s32.totalorder %s1116_s16, 1  ;;  %p1117_p5 = scmp.ge.s32.totalorder %s1616_s14, 1 }
  0x15   : > { %p1723_p4 = por %p2060_p1, %p71_p0  ;;  %p292_p7 = scmp.lt.s32.totalorder %s1616_s14, 3 }
  0x16   : > { %p1728_p6 = por %p285_p3, %p71_p0  ;;  %s1618_s20 = smov [#allocation11]  }
  0x17   : > { %s2095_s17 = scalar_select %p1723_p4, 1, 0 }
  0x18   : > { %s2096_s18 = scalar_select %p1728_p6, 1, 0 }
  0x19   : > { %p1733_p8 = pnand %p1117_p5, %p292_p7  ;;  %s304_s21 = sshll.u32 %s1618_s20, 4  ;;  %s305_s21 = int_to_ptr.vmem [resolvable:$true] %s304_s21 }
  0x1a   : > { %2097 = sst [smem:[#allocation26_spill]] %s2096_s18  ;;  %s49_s23 = sadd.s32 1, %s1612_s13 }
  0x1b   : > { %s2098_s19 = scalar_select %p1733_p8, 1, 0 }
  0x1c   : > { %p1247_p9 = pneg %p1733_p8  ;;  %s2100_s3 = sld [smem:[#allocation31_spill]] }
  0x1e   : > { %p1742_p11 = pnand %p1247_p9, %p2060_p1 }
  0x20   : > { %s2099_s22 = scalar_select %p1742_p11, 1, 0 }
  0x21   : > { %p1755_p13 = pneg %p1742_p11 }
  0x22   : > { %s1348_s26 = scalar_lea.hbm %s2100_s3, 512 }
  0x23   : > { %p1349_p12 = scmp.ne.s32.totalorder %s2100_s3, %s1348_s26  ;;  %p1355_p5 = scmp.lt.u32.totalorder %s1348_s26, %s2100_s3 }
  0x24   : > { %s2101_s29 = scalar_select %p1755_p13, 1, 0 }
  0x25   : > { %p1351_p0 = pnand %p1755_p13, %p1349_p12 }
  0x27   : > { %p1352_p3 = pneg %p1351_p0 }
  0x29   : > { %p1357_p7 = pnand %p1355_p5, %p1352_p3 }
  0x2b   : > { %1360 = shalt.err (!%p1357_p7)
}
  0x2c   : > { %s1361_s24 = scalar_lea.vmem %s305_s21, 512  ;;  %p1369_p2 = scmp.lt.s32.totalorder %s305_s21, %s305_s21 }
  0x2d   : > { %p1362_p9 = scmp.ne.s32.totalorder %s305_s21, %s1361_s24  ;;  %p1370_p6 = scmp.lt.s32.totalorder %s1361_s24, %s1361_s24 }
  0x2f   : > { %p1364_p10 = pnand %p1362_p9, %p1755_p13  ;;  %p1371_p4 = por %p1370_p6, %p1369_p2 }
  0x31   : > { %p1365_p1 = pneg %p1364_p10 }
  0x33   : > { %p1372_p8 = pnand %p1371_p4, %p1365_p1 }
  0x35   : > { %1375 = shalt.err (!%p1372_p8)
}
  0x36   : > { %s2064_s25 = smov 128   ;;  %s2066_s26 = smov 8  }
  0x37   : > { %1250 = dma.hbm_to_vmem [thread:$0]  (!%p1742_p11), %s2100_s3, 512, %s305_s21, [#allocation12], %s2064_s25, %s2064_s25, %s2066_s26  }
  0x38   : > { %p51_p1 = scmp.ge.s32.totalorder %s49_s23, 2  ;;  %s58_s16 = sadd.s32 1, %s1604_s11 }
  0x39   : > { %p65_p2 = scmp.ne.s32.totalorder %s1604_s11, %s1600_s10  ;;  %p66_p4 = scmp.eq.s32.totalorder %s1616_s14, 0 }
  0x3a   : > { %s2142_s23 = smov (%p51_p1, %s49_s23), 0  ;;  %p2103_p8 = scmp.eq.s32.totalorder %s1714_s15, 1 }
  0x3b   : > { %2102 = sst [smem:[#allocation27_spill]] %s2142_s23  ;;  %p67_p6 = por %p66_p4, %p65_p2 }
  0x3c   : > { %p1782_p10 = por %p2103_p8, %p65_p2  ;;  %s53_s24 = ssub.s32 %s1612_s13, %s2142_s23 }
  0x3d   : > { %p1274_p12 = scmp.lt.s32.totalorder %s1616_s14, 2  ;;  %p56_p0 = scmp.eq.s32.totalorder %s53_s24, 0 }
  0x3e   : > { %s2104_s20 = scalar_select %p1782_p10, 1, 0 }
  0x3f   : > { %s2069_s18 = sand.u32 1, %s1604_s11   ;;  %s1795_s27 = sshll.u32 %s1612_s13, 7 }
  0x40   : > { %2105 = sst [smem:[#allocation28_spill]] %s2104_s20  ;;  %s1792_s21 = sshll.u32 %s2069_s18, 3 }
  0x41   : > { %s1798_s28 = scalar_select %p56_p0, %s1604_s11, %s58_s16  }
  0x42   : > { %p1800_p3 = pnand %p1274_p12, %p67_p6  ;;  %s372_s26 = sand.u32 1, %s1616_s14  }
  0x43   : > { %2106 = sst [smem:[#allocation29_spill]] %s1798_s28  ;;  %s2108_s1 = sld [smem:[#allocation30_spill]] }
  0x44   : > { %s2107_s25 = scalar_select %p1800_p3, 1, 0 }
  0x45   : > { %s376_s18 = scalar_lea.vmem [#allocation8], %s1792_s21  ;;  %s1621_s16 = smov [#allocation13]  }
  0x46   : > { %s384_s13 = sshll.u32 %s376_s18, 4  ;;  %s1814_s28 = sshll.u32 %s1621_s16, 4  ;;  %s1812_s13 = int_to_ptr.vmem [resolvable:$true] %s384_s13  ;;  %s321_s28 = int_to_ptr.vmem [resolvable:$true] %s1814_s28 }
  0x47   : > { %s1816_s30 = scalar_lea.sflag [#allocation9], %s372_s26  ;;  %p1822_p7 = pneg %p1800_p3 }
  0x49   : > { %s1809_s24 = scalar_lea.hbm %s2108_s1, %s1795_s27  ;;  %s1381_s14 = scalar_lea.hbm %s2108_s1, 256 }
  0x4a   : > { %s1376_s9 = scalar_lea.hbm %s1809_s24, 128  ;;  %p1382_p2 = scmp.lt.u32.totalorder %s1809_s24, %s2108_s1 }
  0x4b   : > { %p1377_p5 = scmp.ne.s32.totalorder %s1809_s24, %s1376_s9  ;;  %p1383_p4 = scmp.lt.u32.totalorder %s1381_s14, %s1376_s9 }
  0x4c   : > { %s2109_s3 = scalar_select %p1822_p7, 1, 0 }
  0x4d   : > { %p1379_p9 = pnand %p1822_p7, %p1377_p5  ;;  %p1384_p6 = por %p1383_p4, %p1382_p2 }
  0x4e   : > { %p1385_p8 = scmp.lt.u32.totalorder %s1376_s9, %s1809_s24 }
  0x4f   : > { %p1380_p1 = pneg %p1379_p9 }
  0x50   : > { %p1386_p12 = por %p1385_p8, %p1384_p6 }
  0x52   : > { %p1387_p0 = pnand %p1386_p12, %p1380_p1 }
  0x54   : > { %1390 = shalt.err (!%p1387_p0)
}
  0x55   : > { %s1391_s26 = scalar_lea.vmem %s1812_s13, 128  ;;  %s1622_s23 = smov [#allocation8]  }
  0x56   : > { %p1392_p5 = scmp.ne.s32.totalorder %s1812_s13, %s1391_s26  ;;  %s1396_s18 = sshll.u32 %s1622_s23, 4  ;;  %s1397_s18 = int_to_ptr.vmem [resolvable:$false] %s1396_s18 }
  0x57   : > { %s1398_s20 = scalar_lea.vmem %s1397_s18, 256  ;;  %p1399_p11 = scmp.lt.s32.totalorder %s1812_s13, %s1397_s18 }
  0x58   : > { %p1394_p9 = pnand %p1392_p5, %p1822_p7  ;;  %p1400_p13 = scmp.lt.s32.totalorder %s1398_s20, %s1391_s26 }
  0x5a   : > { %p1395_p10 = pneg %p1394_p9  ;;  %p1401_p2 = por %p1400_p13, %p1399_p11 }
  0x5c   : > { %p1402_p4 = pnand %p1401_p2, %p1395_p10 }
  0x5e   : > { %1405 = shalt.err (!%p1402_p4)
}
  0x5f   : > { %1263 = dma.hbm_to_vmem [thread:$0]  (!%p1800_p3), %s1809_s24, 128, %s1812_s13, %s1816_s30  }
  0x60   : > { %s1406_s16 = scalar_lea.hbm %s2055_s5, 512  ;;  %p2110_p11 = scmp.ne.s32.totalorder %s2101_s29, 0 }
  0x61   : > { %p1407_p1 = scmp.ne.s32.totalorder %s2055_s5, %s1406_s16  ;;  %p1413_p6 = scmp.lt.u32.totalorder %s1406_s16, %s2055_s5 }
  0x63   : > { %p1409_p13 = pnand %p1407_p1, %p2110_p11 }
  0x65   : > { %p1410_p10 = pneg %p1409_p13 }
  0x67   : > { %p1415_p8 = pnand %p1413_p6, %p1410_p10 }
  0x69   : > { %1418 = shalt.err (!%p1415_p8)
}
  0x6a   : > { %s1419_s20 = scalar_lea.vmem %s321_s28, 512  ;;  %p1427_p9 = scmp.lt.s32.totalorder %s321_s28, %s321_s28 }
  0x6b   : > { %p1420_p12 = scmp.ne.s32.totalorder %s321_s28, %s1419_s20  ;;  %p1428_p2 = scmp.lt.s32.totalorder %s1419_s20, %s1419_s20 }
  0x6d   : > { %p1422_p0 = pnand %p1420_p12, %p2110_p11  ;;  %p1429_p4 = por %p1428_p2, %p1427_p9 }
  0x6f   : > { %p1423_p5 = pneg %p1422_p0 }
  0x71   : > { %p1430_p3 = pnand %p1429_p4, %p1423_p5 }
  0x73   : > { %1433 = shalt.err (!%p1430_p3)
}
  0x74   : > { %p2111_p1 = scmp.ne.s32.totalorder %s2099_s22, 0  ;;  %s2112_s1 = smov 8  }
  0x75   : > { %s2113_s13 = smov 128   ;;  %s1623_s14 = smov [#allocation14]  }
  0x76   : > { %1253 = dma.hbm_to_vmem [thread:$0]  (!%p2111_p1), %s2055_s5, 512, %s321_s28, [#allocation12], %s2113_s13, %s2113_s13, %s2112_s1  }
  0x77   : > { %s336_s16 = sshll.u32 %s1623_s14, 4  ;;  %s1434_s18 = scalar_lea.hbm %s2057_s7, 512  ;;  %s337_s16 = int_to_ptr.vmem [resolvable:$true] %s336_s16 }
  0x78   : > { %p1435_p3 = scmp.ne.s32.totalorder %s2057_s7, %s1434_s18  ;;  %p1441_p6 = scmp.lt.u32.totalorder %s1434_s18, %s2057_s7 }
  0x7a   : > { %p1437_p13 = pnand %p1435_p3, %p2110_p11 }
  0x7c   : > { %p1438_p10 = pneg %p1437_p13 }
  0x7e   : > { %p1443_p8 = pnand %p1441_p6, %p1438_p10 }
  0x80   : > { %1446 = shalt.err (!%p1443_p8)
}
  0x81   : > { %s1447_s28 = scalar_lea.vmem %s337_s16, 512  ;;  %p1455_p9 = scmp.lt.s32.totalorder %s337_s16, %s337_s16 }
  0x82   : > { %p1448_p12 = scmp.ne.s32.totalorder %s337_s16, %s1447_s28  ;;  %p1456_p2 = scmp.lt.s32.totalorder %s1447_s28, %s1447_s28 }
  0x84   : > { %p1450_p0 = pnand %p1448_p12, %p2110_p11  ;;  %p1457_p4 = por %p1456_p2, %p1455_p9 }
  0x86   : > { %p1451_p5 = pneg %p1450_p0 }
  0x88   : > { %p1458_p7 = pnand %p1457_p4, %p1451_p5 }
  0x8a   : > { %1461 = shalt.err (!%p1458_p7)
}
  0x8b   : > { %1256 = dma.hbm_to_vmem [thread:$0]  (!%p2111_p1), %s2057_s7, 512, %s337_s16, [#allocation15], %s2113_s13, %s2113_s13, %s2112_s1  }
  0x8c   : > { %s1893_s24 = scalar_lea.hbm %s2050_s0, %s1795_s27  ;;  %s357_s22 = scalar_lea.vmem [#allocation5], %s1792_s21 }
  0x8d   : > { %s365_s9 = sshll.u32 %s357_s22, 4  ;;  %s2114_s14 = sand.u32 1, %s1604_s11   ;;  %s366_s9 = int_to_ptr.vmem [resolvable:$true] %s365_s9 }
  0x8e   : > { %s354_s23 = scalar_lea.sflag [#allocation6], %s2114_s14  ;;  %s1462_s26 = scalar_lea.hbm %s1893_s24, 128 }
  0x8f   : > { %p1463_p7 = scmp.ne.s32.totalorder %s1893_s24, %s1462_s26  ;;  %p2115_p11 = scmp.ne.s32.totalorder %s2109_s3, 0 }
  0x90   : > { %s1467_s16 = scalar_lea.hbm %s2050_s0, 256  ;;  %p1468_p1 = scmp.lt.u32.totalorder %s1893_s24, %s2050_s0 }
  0x91   : > { %p1465_p3 = pnand %p1463_p7, %p2115_p11  ;;  %p1469_p10 = scmp.lt.u32.totalorder %s1467_s16, %s1462_s26 }
  0x92   : > { %p1471_p8 = scmp.lt.u32.totalorder %s1462_s26, %s1893_s24 }
  0x93   : > { %p1466_p13 = pneg %p1465_p3  ;;  %p1470_p6 = por %p1469_p10, %p1468_p1 }
  0x95   : > { %p1472_p12 = por %p1471_p8, %p1470_p6 }
  0x97   : > { %p1473_p0 = pnand %p1472_p12, %p1466_p13 }
  0x99   : > { %1476 = shalt.err (!%p1473_p0)
}
  0x9a   : > { %s1477_s28 = scalar_lea.vmem %s366_s9, 128  ;;  %s1624_s4 = smov [#allocation5]  }
  0x9b   : > { %p1478_p5 = scmp.ne.s32.totalorder %s366_s9, %s1477_s28  ;;  %s1482_s8 = sshll.u32 %s1624_s4, 4  ;;  %s1483_s8 = int_to_ptr.vmem [resolvable:$false] %s1482_s8 }
  0x9c   : > { %s1484_s12 = scalar_lea.vmem %s1483_s8, 256  ;;  %p1485_p4 = scmp.lt.s32.totalorder %s366_s9, %s1483_s8 }
  0x9d   : > { %p1480_p9 = pnand %p1478_p5, %p2115_p11  ;;  %p1486_p7 = scmp.lt.s32.totalorder %s1484_s12, %s1477_s28 }
  0x9f   : > { %p1481_p2 = pneg %p1480_p9  ;;  %p1487_p3 = por %p1486_p7, %p1485_p4 }
  0xa1   : > { %p1488_p1 = pnand %p1487_p3, %p1481_p2 }
  0xa3   : > { %1491 = shalt.err (!%p1488_p1)
}
  0xa4   : > { %p2116_p10 = scmp.ne.s32.totalorder %s2107_s25, 0  ;;  %s1919_s14 = scalar_lea.hbm %s2052_s2, %s1795_s27 }
  0xa5   : > { %s395_s26 = scalar_lea.vmem [#allocation10], %s1792_s21  ;;  %s1492_s13 = scalar_lea.hbm %s1919_s14, 128 }
  0xa6   : > { %1260 = dma.hbm_to_vmem [thread:$0]  (!%p2116_p10), %s1893_s24, 128, %s366_s9, %s354_s23  }
  0xa7   : > { %s403_s1 = sshll.u32 %s395_s26, 4  ;;  %p1493_p13 = scmp.ne.s32.totalorder %s1919_s14, %s1492_s13  ;;  %s404_s1 = int_to_ptr.vmem [resolvable:$true] %s403_s1 }
  0xa8   : > { %s1497_s24 = scalar_lea.hbm %s2052_s2, 256  ;;  %p1498_p12 = scmp.lt.u32.totalorder %s1919_s14, %s2052_s2 }
  0xa9   : > { %p1495_p6 = pnand %p1493_p13, %p2115_p11  ;;  %p1499_p0 = scmp.lt.u32.totalorder %s1497_s24, %s1492_s13 }
  0xaa   : > { %p1501_p9 = scmp.lt.u32.totalorder %s1492_s13, %s1919_s14 }
  0xab   : > { %p1496_p8 = pneg %p1495_p6  ;;  %p1500_p5 = por %p1499_p0, %p1498_p12 }
  0xad   : > { %p1502_p2 = por %p1501_p9, %p1500_p5 }
  0xaf   : > { %p1503_p4 = pnand %p1502_p2, %p1496_p8 }
  0xb1   : > { %1506 = shalt.err (!%p1503_p4)
}
  0xb2   : > { %s1507_s21 = scalar_lea.vmem %s404_s1, 128  ;;  %s1625_s27 = smov [#allocation10]  }
  0xb3   : > { %p1508_p7 = scmp.ne.s32.totalorder %s404_s1, %s1507_s21  ;;  %s1512_s20 = sshll.u32 %s1625_s27, 4  ;;  %s1513_s20 = int_to_ptr.vmem [resolvable:$false] %s1512_s20 }
  0xb4   : > { %s1514_s28 = scalar_lea.vmem %s1513_s20, 256  ;;  %p1515_p13 = scmp.lt.s32.totalorder %s404_s1, %s1513_s20 }
  0xb5   : > { %p1510_p3 = pnand %p1508_p7, %p2115_p11  ;;  %p1516_p6 = scmp.lt.s32.totalorder %s1514_s28, %s1507_s21 }
  0xb7   : > { %p1511_p1 = pneg %p1510_p3  ;;  %p1517_p10 = por %p1516_p6, %p1515_p13 }
  0xb9   : > { %p1518_p0 = pnand %p1517_p10, %p1511_p1 }
  0xbb   : > { %1521 = shalt.err (!%p1518_p0)
}
  0xbc   : > { %p2117_p12 = scmp.ne.s32.totalorder %s2107_s25, 0  ;;  %p2118_p8 = scmp.ne.s32.totalorder %s2098_s19, 0 }
  0xbd   : > { %s1943_s3 = sand.u32 (!%p2118_p8), 1, %s1600_s10   ;;  %p2119_p11 = scmp.ne.s32.totalorder (!%p2118_p8), %s2095_s17, 0 }
  0xbe   : > { %1266 = dma.hbm_to_vmem [thread:$0]  (!%p2117_p12), %s1919_s14, 128, %s404_s1, %s1816_s30  }
  0xbf   : > { %412 = sbr.rel (%p2118_p8) target bundleno = 1306 (0x51a), region = 56  ;;  %s1946_s4 = sshll.u32 (!%p2118_p8), %s1943_s3, 3 }
  0xc0   : > { %s415_s8 = scalar_lea.sflag (!%p2118_p8), [#allocation6], %s1943_s3  ;;  %s418_s12 = scalar_lea.vmem (!%p2118_p8), [#allocation5], %s1946_s4 }
  0xc6   : > { %1575 = dma.done.wait (%p2119_p11), %s415_s8, 128  }
  0xc7   : > { %1577 = vsyncadd (%p2119_p11), %s415_s8, 4294967168  ;;  %s423_s30 = sand.u32 1, %s1714_s15   ;;  %s427_s25 = scalar_lea.vmem [#allocation8], %s1946_s4 }
  0xc8   : > { %s424_s19 = scalar_lea.sflag [#allocation9], %s423_s30 }
  0xc9   : > { %1579 = dma.done.wait (%p2119_p11), %s424_s19, 256  }
  0xca   : > { %1581 = vsyncadd (%p2119_p11), %s424_s19, 4294967040  ;;  %s436_s29 = scalar_lea.vmem [#allocation10], %s1946_s4  ;;  %p2120_p10 = scmp.eq.s32.totalorder %s1714_s15, 0 }
  0xcc   : > { %1583 = dma.done.wait (%p2120_p10), [#allocation12], 1024   ;;  %p2121_p5 = pmov %p2120_p10 }
  0xce   : > { %1585 = vsyncadd (%p2121_p5), [#allocation12], 4294966272  ;;  %p2122_p9 = pmov %p2121_p5 }
  0xcf   : > { %p2123_p2 = pmov %p2121_p5 }
  0xd0   : > { %1587 = dma.done.wait (%p2122_p9), [#allocation15], 512  }
  0xd1   : > { %1589 = vsyncadd (%p2123_p2), [#allocation15], 4294966784  ;;  %v1626_v0 = vmov 0.0|0.0   ;;  %vm1627_vm0 = vmmov 0   ;;  %v1628_v1 = vmov 0.0   ;;  %v589_v2 = vld [vmem:[#allocation13] sm:$0xff] }
  0xd2   : > { %1215 = vmatprep.subr.bf16.mxu1 %v1626_v0  ;;  %1209 = vmatprep.subr.bf16.mxu0 %v1626_v0  ;;  %v590_v3 = vld [vmem:[#allocation13 + $0x8] sm:$0xff]  ;;  %v498_v4 = vld [vmem:[#allocation11] sm:$0xff]  ;;  %v591_v7 = vld [vmem:[#allocation13 + $0x10] sm:$0xff]  ;;  %vm509_vm1 = vcmask 261120   ;;  %s2124_s26 = sld [smem:[#allocation32_spill]]  ;;  %vm585_vm2 = vcmask 7168  }
  0xd3   : > { %1185 = vmatprep.mubr.msk.f32.mxu1 %vm1627_vm0, %v1628_v1  ;;  %1174 = vmatprep.mubr.msk.f32.mxu0 %vm1627_vm0, %v1628_v1  ;;  %v1216_v5 = vpack.c.bf16 %v590_v3, %v589_v2  ;;  %v499_v6 = vld [vmem:[#allocation11 + $0x8] sm:$0xff]  ;;  %v592_v8 = vld [vmem:[#allocation13 + $0x18] sm:$0xff]  ;;  %v500_v10 = vld [vmem:[#allocation11 + $0x10] sm:$0xff]  ;;  %v1629_v30 = vmov -inf   ;;  %vm831_vm3 = vcmask 64512   ;;  %v1630_v36 = vmov 0  }
  0xd4   : > { %v1210_v9 = vpack.c.bf16 %v499_v6, %v498_v4  ;;  %v501_v11 = vld [vmem:[#allocation11 + $0x18] sm:$0xff]  ;;  %v1219_v12 = vpack.c.bf16 %v592_v8, %v591_v7  ;;  %v588_v14 = vld [vmem:[%s427_s25] sm:$0xff]  ;;  %v677_v27 = vld [vmem:[#allocation14 + $0x10] sm:$0xff]  ;;  %586 = vst.msk [vmem:[#allocation3] sm:$0xff] %vm585_vm2, %v1629_v30  ;;  %1338 = vset.pattern.permute.xlu0 %v1630_v36  ;;  %1339 = vset.pattern.permute.xlu1 %v1630_v36  ;;  %s2125_s16 = sld [smem:[#allocation33_spill]]  ;;  %s2126_s18 = sld [smem:[#allocation23_spill]] }
  0xd5   : > { %1217 = vmatpush3.bf16.msra.mxu1 %v1216_v5  ;;  %v1213_v13 = vpack.c.bf16 %v501_v11, %v500_v10  ;;  %v497_v15 = vld [vmem:[%s418_s12] sm:$0xff]  ;;  %v1138_v16 = vld [vmem:[%s2056_s6] ss:$0 sm:$0xff]  ;;  %v675_v25 = vld [vmem:[#allocation14] sm:$0xff]  ;;  %v1631_v51 = vmov 24   ;;  %s2127_s24 = sld [smem:[#allocation28_spill]] }
  0xd6   : > { %1211 = vmatpush3.bf16.msra.mxu0 %v1210_v9  ;;  %1218 = vmatprep.subr.bf16.mxu1 %v1626_v0  ;;  %v676_v26 = vld [vmem:[#allocation14 + $0x8] sm:$0xff]  ;;  %v678_v29 = vld [vmem:[#allocation14 + $0x18] sm:$0xff]  ;;  %s492_s23 = scalar_lea.vmem [#allocation16], %s1946_s4  ;;  %s2128_s28 = sld [smem:[#allocation34_spill]] }
  0xd7   : > { %1212 = vmatprep.subr.bf16.mxu0 %v1626_v0  ;;  %v1222_v28 = vpack.c.bf16 %v676_v26, %v675_v25  ;;  %v1225_v31 = vpack.c.bf16 %v678_v29, %v677_v27  ;;  %v674_v32 = vld [vmem:[%s436_s29] sm:$0xff]  ;;  %s958_s21 = sshll.u32 %s492_s23, 4  ;;  %s944_s12 = scalar_lea.sflag [#allocation7], %s1943_s3  ;;  %s2003_s21 = int_to_ptr.vmem [resolvable:$true] %s958_s21 }
  0xd8   : > { %v1136_v17 = vld [vmem:[%s2124_s26] ss:$0 sm:$0xff]  ;;  %s1522_s30 = scalar_lea.vmem %s2003_s21, 128  ;;  %s1632_s4 = smov [#allocation16]  }
  0xd9   : > { %1220 = vmatpush3.bf16.msra.mxu1 %v1219_v12  ;;  %p1523_p4 = scmp.ne.s32.totalorder %s2003_s21, %s1522_s30  ;;  %s1526_s19 = sshll.u32 %s1632_s4, 4  ;;  %s1527_s19 = int_to_ptr.vmem [resolvable:$false] %s1526_s19 }
  0xda   : > { %1214 = vmatpush3.bf16.msra.mxu0 %v1213_v13  ;;  %1199 = vmatprep.subr.mxu1 %v1628_v1  ;;  %v1140_v42 = vld [vmem:[%s2125_s16] ss:$0 sm:$0xff]  ;;  %s1144_s9 = sshll.u32 %s2126_s18, 7  ;;  %s1528_s25 = scalar_lea.vmem %s1527_s19, 256 }
  0xdb   : > { %1221 = vmatprep.subr.bf16.mxu0 %v1626_v0  ;;  %v830_v37 = vld [vmem:[#allocation3] sm:$0xff]  ;;  %p2129_p7 = scmp.ne.s32.totalorder %s2127_s24, 0  ;;  %p1529_p13 = scmp.lt.s32.totalorder %s2003_s21, %s1527_s19 }
  0xdc   : > { %1186 = vmatmul.mubr.msk.f32.vlgmr.msra.gmra.mrb[0].mxu1 %vm509_vm1, %v588_v14  ;;  %s2001_s8 = scalar_lea.hbm %s2128_s28, %s1144_s9  ;;  %p1530_p6 = scmp.lt.s32.totalorder %s1528_s25, %s1522_s30 }
  0xdd   : > { %1175 = vmatmul.mubr.msk.f32.vlgmr.msra.gmra.mrb[0].mxu0 %vm509_vm1, %v497_v15  ;;  %1201 = vmatprep.mubr.msk.f32.mxu1 %vm1627_vm0, %v1628_v1  ;;  %p1524_p3 = pnand %p1523_p4, %p2129_p7 }
  0xde   : > { %1196 = vmatprep.mubr.msk.f32.mxu0 %vm1627_vm0, %v1628_v1  ;;  %1223 = vmatpush3.bf16.msra.mxu0 %v1222_v28  ;;  %p1531_p0 = por %p1530_p6, %p1529_p13 }
  0xdf   : > { %1224 = vmatprep.subr.bf16.mxu0 %v1626_v0  ;;  %p1525_p1 = pneg %p1524_p3 }
  0xe1   : > { %p1532_p12 = pnand %p1531_p0, %p1525_p1 }
  0xe2   : > { %1226 = vmatpush3.bf16.msra.mxu0 %v1225_v31 }
  0xe5   : > { %1197 = vmatmul.mubr.msk.f32.vlgmr.msra.gmra.mrb[2].mxu0 %vm509_vm1, %v674_v32 }
 0x1af   : > { %v670_v18 = vpop.f32.mrb[0].mxu1 }
 0x1b0   : > { %v671_v19 = vadd.f32 %v1138_v16, %v670_v18  ;;  %v579_v20 = vpop.f32.mrb[0].mxu0  ;;  %v1187_v21 = vpop.f32.mrb[1].mxu1 }
 0x1b1   : > { %v580_v22 = vadd.f32 %v1136_v17, %v579_v20  ;;  %v1176_v23 = vpop.f32.mrb[1].mxu0 }
 0x1b2   : > { %1200 = vmatpush3.xpose.msra.mxu1 %v671_v19 }
 0x1b3   : > { %v583_v24 = vmul.f32 0.25, %v580_v22  ;;  %1204 = vmatprep.subr.mxu1 %v1628_v1 }
 0x1b5   : > { %1202 = vmatmul.mubr.f32.vlgmr.msra.gmra.mrb[2].mxu1 %v583_v24 }
 0x1b6   : > { %1206 = vmatprep.mubr.msk.f32.mxu1 %vm1627_vm0, %v1628_v1 }
 0x1b8   : > { %v755_v43 = vpop.f32.mrb[2].mxu0 }
 0x1b9   : > { %v756_v44 = vadd.f32 %v1140_v42, %v755_v43  ;;  %v1198_v45 = vpop.f32.mrb[3].mxu0 }
 0x1bb   : > { %1205 = vmatpush3.msra.mxu1 %v756_v44 }
 0x288   : > { %v826_v33 = vpop.f32.mrb[2].mxu1 }
 0x289   : > { %v1203_v34 = vpop.f32.mrb[3].mxu1  ;;  %v832_v35 = vsel %vm831_vm3, %v826_v33, -inf }
 0x28a   : > { %833 = vmax.xlane.f32.xlu0 %v832_v35 }
 0x317   : > { %v834_v38 = vpop.xlane.xlu0 %833 }
 0x318   : > { %v835_v39 = vmax.f32 %v830_v37, %v834_v38 }
 0x31a   : > { %v836_v40 = vsub.f32 %v830_v37, %v835_v39  ;;  %930 = vst.msk [vmem:[#allocation3] sm:$0xff] %vm585_vm2, %v835_v39  ;;  %841 = vperm.xlu0 %1338, %v835_v39  }
 0x31c   : > { %v837_v41 = vmul.f32 1.442695, %v836_v40 }
 0x31e   : > { %1342 = vpow2.f32 %v837_v41  ;;  %1341 = vset.pattern.permute.xlu0 %v1631_v51 }
 0x328   : > { %v1343_v46 = vpop.eup %1342 }
 0x329   : > { %850 = vperm.xlu1 %1339, %v1343_v46  }
 0x32d   : > { %1340 = vset.pattern.permute.xlu1 %v1631_v51 }
 0x399   : > { %v842_v47 = vpop.permute.xlu0 %841 }
 0x39a   : > { %v844_v48 = vsub.f32 %v826_v33, %v842_v47 }
 0x39c   : > { %v845_v49 = vmul.f32 1.442695, %v844_v48 }
 0x39e   : > { %1344 = vpow2.f32 %v845_v49 }
 0x3a8   : > { %v1345_v50 = vpop.eup %1344  ;;  %v851_v52 = vpop.permute.xlu1 %850 }
 0x3a9   : > { %1207 = vmatmul.mubr.msk.f32.vlgmr.msra.gmra.mrb[4].mxu1 %vm831_vm3, %v1345_v50  ;;  %v853_v53 = vmul.f32 0.0, %v851_v52 }
 0x47c   : > { %v923_v54 = vpop.f32.mrb[4].mxu1 }
 0x47d   : > { %v927_v55 = vadd.f32 %v923_v54, %v853_v53  ;;  %v1208_v56 = vpop.f32.mrb[5].mxu1 }
 0x47f   : > { %937 = vperm.xlu1 %1340, %v927_v55  }
 0x4fe   : > { %v938_v57 = vpop.permute.xlu1 %937 }
 0x4ff   : > { %1346 = vrcp.f32 %v938_v57 }
 0x509   : > { %v1347_v58 = vpop.eup %1346 }
 0x50a   : > { %v941_v59 = vmul.f32 %v1347_v58, %v927_v55 }
 0x50c   : > { %942 = vst [vmem:[%s492_s23] sm:$0xff] %v941_v59 }
 0x50d   : > { %1535 = shalt.err (!%p1532_p12)
}
 0x50e   : > { %s1536_s3 = scalar_lea.hbm %s2001_s8, 128  ;;  %s1540_s17 = scalar_lea.hbm %s2128_s28, 256 }
 0x50f   : > { %p1537_p8 = scmp.ne.s32.totalorder %s2001_s8, %s1536_s3  ;;  %p1541_p5 = scmp.lt.u32.totalorder %s2001_s8, %s2128_s28 }
 0x510   : > { %p1542_p9 = scmp.lt.u32.totalorder %s1540_s17, %s1536_s3  ;;  %p1544_p4 = scmp.lt.u32.totalorder %s1536_s3, %s2001_s8 }
 0x511   : > { %p1538_p11 = pnand %p1537_p8, %p2129_p7 }
 0x512   : > { %p1543_p2 = por %p1542_p9, %p1541_p5 }
 0x513   : > { %p1539_p10 = pneg %p1538_p11 }
 0x514   : > { %p1545_p3 = por %p1544_p4, %p1543_p2 }
 0x516   : > { %p1546_p1 = pnand %p1545_p3, %p1539_p10 }
 0x518   : > { %1549 = shalt.err (!%p1546_p1)
}
 0x519   : > { %1245 = dma.vmem_to_hbm [thread:$0]  (%p2129_p7), %s2003_s21, 128, %s2001_s8, %s944_s12  }
 0x51a PF: > { %s2130_s26 = sld [smem:[#allocation22_spill]]  ;;  %s2131_s1 = sld [smem:[#allocation26_spill]] }
 0x51b   : > { %s2132_s13 = sld [smem:[#allocation25_spill]] }
 0x520   : > { %s970_s16 = sand.u32 1, %s2130_s26   ;;  %p2133_p13 = scmp.ne.s32.totalorder %s2131_s1, 0 }
 0x521   : > { %p2134_p6 = scmp.ge.s32.totalorder %s2132_s13, 2  ;;  %s971_s18 = scalar_lea.sflag [#allocation7], %s970_s16 }
 0x523   : > { %p1268_p0 = pnand %p2134_p6, %p2133_p13 }
 0x525   : > { %1591 = dma.done.wait (!%p1268_p0), %s971_s18, 128  }
 0x526   : > { %1593 = vsyncadd (!%p1268_p0), %s971_s18, 4294967168  ;;  %s30_s14 = sadd.s32 1, %s2132_s13   ;;  %s2135_s24 = sld [smem:[#allocation29_spill]] }
 0x527   : > { %p27_p12 = scmp.ge.s32.totalorder %s30_s14, 4   ;;  %s2136_s12 = sld [smem:[#allocation24_spill]] }
 0x528   : > { %s2137_s13 = sld [smem:[#allocation27_spill]]  ;;  %s2138_s30 = smov %s1600_s10 }
 0x529   : > { %s2139_s10 = smov %s1604_s11  ;;  %29 = sbr.rel (!%p27_p12) target bundleno = 16 (0x10), region = 145 }
 0x52c   : > { %s2140_s11 = smov %s2135_s24 }
 0x530   :  { %976 = vsyncpa [#allocation6], 1 }
 0x531   :  { %978 = vsyncpa [#allocation6 + $0x1], 1 }
 0x532   :  { %979 = vsyncpa [#allocation9], 1 }
 0x533   :  { %981 = vsyncpa [#allocation9 + $0x1], 1 }
 0x534   :  { %982 = vsyncpa [#allocation12], 1 }
 0x535   :  { %983 = vsyncpa [#allocation15], 1 }
 0x536   :  { %984 = vsyncpa [#allocation7], 1 }
 0x537   :  { %986 = vsyncpa [#allocation7 + $0x1], 1 }

</bundles_post_ra>
